<compile_context>
chip_gen: v7x
topology: tpu7x:2x2x1
jax: 0.10.0
libtpu: 0.0.40
codegen_flags: <defaults>
</compile_context>

<pallas_src>
import functools

import jax
import jax.numpy as jnp
from jax.experimental import pallas as pl
from jax.experimental.pallas import tpu as pltpu

P = 128  # padded lane width for every feature dimension (vreg lane count)


def _round_up(x, m):
    return (x + m - 1) // m * m


def _mlp_kernel(x_ref, w_ref, b_ref, out_ref):
    """One batch tile of the full 5-layer MLP.

    x_ref   : (TM, P) bf16 — fused [x1 | x2 | zero pad] rows.
    w_ref   : (5, P, P) bf16 — [W1, W2, W3, W4, W5], zero-padded to 128x128.
    b_ref   : (8, P)    f32 — rows 0..4 = b1..b5 (zero-padded), rows 5..7 unused.
    out_ref : (TM, P)   f32 — lane-dense sigmoid output; real columns are sliced
              out in the wrapper.  Padded lanes/rows are NOT zero.
    """
    b = b_ref[...]
    h = x_ref[...]                                    # bf16 MXU operand

    # fc1..fc4 + ReLU (unrolled at trace time).  Padded weight rows/cols and
    # bias lanes are exact zeros, so padded lanes stay zero through ReLU.
    for l in range(4):
        acc = jnp.dot(h, w_ref[l], preferred_element_type=jnp.float32) + b[l:l + 1, :]
        h = jnp.maximum(acc, 0.0).astype(jnp.bfloat16)

    z = jnp.dot(h, w_ref[4], preferred_element_type=jnp.float32) + b[4:5, :]

    # Exact sigmoid in f32: 1 / (1 + exp(-z)).
    out_ref[...] = (1.0 / (1.0 + jnp.exp(-z))).astype(out_ref.dtype)


def init_params(key, input_size1, input_size2, hidden_size, output_size):
    """Deterministic PyTorch-style (U[-1/sqrt(fan_in), 1/sqrt(fan_in)]) init.

    Weights are (fan_in, fan_out); biases are (1, fan_out).
    """
    dims = [
        (input_size1 + input_size2, hidden_size),
        (hidden_size, hidden_size // 2),
        (hidden_size // 2, hidden_size // 4),
        (hidden_size // 4, hidden_size // 2),
        (hidden_size // 2, output_size),
    ]
    params = []
    for (fan_in, fan_out) in dims:
        key, kw, kb = jax.random.split(key, 3)
        bound = 1.0 / jnp.sqrt(jnp.float32(fan_in))
        w = jax.random.uniform(kw, (fan_in, fan_out), jnp.float32, -bound, bound)
        b = jax.random.uniform(kb, (1, fan_out), jnp.float32, -bound, bound)
        params.append((w, b))
    return params


def pack_params(params):
    """Pack the 5 layers ONCE (weights are static across forward calls).

    Returns:
      w_packed: (5, P, P) bf16 slab [W1, W2, W3, W4, W5], zero-padded.
      b_packed: (8, P)    f32 slab, rows 0..4 = b1..b5 zero-padded, rows 5..7 = 0.
    """
    assert len(params) == 5
    w_list, b_list = [], []
    for (w, b) in params:
        fi, fo = w.shape
        assert fi <= P and fo <= P, "feature dims must be <= 128"
        w_list.append(jnp.pad(w.astype(jnp.bfloat16), ((0, P - fi), (0, P - fo))))
        b_list.append(jnp.pad(b.reshape(-1).astype(jnp.float32), (0, P - fo)))
    w_packed = jnp.stack(w_list)                                        # (5, P, P)
    b_packed = jnp.concatenate(
        [jnp.stack(b_list), jnp.zeros((3, P), jnp.float32)], axis=0)    # (8, P)
    return w_packed, b_packed


@functools.partial(jax.jit, static_argnames=("output_size", "tm"))
def hypernym_forward(x1, x2, w_packed, b_packed, *, output_size, tm=2048):
    """Forward pass matching HypernymPredictionModel.forward.

    x1: (B, in1), x2: (B, in2) with in1 + in2 <= 128.
    w_packed/b_packed: slabs from pack_params (packed once, reused per call).
    """
    B, in1 = x1.shape
    _, in2 = x2.shape
    in_total = in1 + in2
    assert in_total <= P, "in1 + in2 must be <= 128 for the padded-lane scheme"

    # Batch tiling: TM rows per grid step, weights VMEM-resident across steps.
    # Guard: >= 2 grid steps whenever B > 8 so both v7x TensorCores get work,
    # while keeping batch padding waste < TM.
    tm = max(8, _round_up(tm, 8))
    n_steps = max(2, -(-B // tm)) if B > 8 else 1
    TM = min(tm, _round_up(-(-B // n_steps), 8))
    B_pad = _round_up(B, TM)

    # Fused concat + bf16 cast + pad: one XLA fusion producing the single
    # lane-dense (B_pad, 128) bf16 input the kernel streams.
    x = jnp.concatenate([x1, x2], axis=1).astype(jnp.bfloat16)
    x = jnp.pad(x, ((0, B_pad - B), (0, P - in_total)))

    grid = (B_pad // TM,)
    cost = pl.CostEstimate(
        flops=2 * B_pad * P * P * 5,
        transcendentals=B_pad * P,
        bytes_accessed=(2 * B_pad * P      # bf16 input stream
                        + 4 * B_pad * P    # f32 output stream
                        + 2 * 5 * P * P    # bf16 weight slab (VMEM-resident)
                        + 4 * 8 * P),      # f32 bias slab (VMEM-resident)
    )

    out = pl.pallas_call(
        _mlp_kernel,
        out_shape=jax.ShapeDtypeStruct((B_pad, P), jnp.float32),
        grid=grid,
        in_specs=[
            pl.BlockSpec((TM, P), lambda i: (i, 0)),        # fused input tile
            pl.BlockSpec((5, P, P), lambda i: (0, 0, 0)),   # weights: resident
            pl.BlockSpec((8, P), lambda i: (0, 0)),         # biases:  resident
        ],
        out_specs=pl.BlockSpec((TM, P), lambda i: (i, 0)),
        compiler_params=pltpu.CompilerParams(
            dimension_semantics=("parallel",),
        ),
        cost_estimate=cost,
    )(x, w_packed, b_packed)

    # Drop the batch/lane padding (padded rows/lanes are NOT zero — they hold
    # sigmoid of bias-propagated values — nothing downstream may rely on them).
    return out[:B, :output_size]


def _reference_forward(x1, x2, params):
    x = jnp.concatenate([x1, x2], axis=1)
    for i, (w, b) in enumerate(params):
        x = x @ w + b
        if i < len(params) - 1:
            x = jnp.maximum(x, 0.0)
    return jax.nn.sigmoid(x)


if __name__ == "__main__":
    # Small, forward-consistent shapes.
    batch = 8
    input_size1 = 16
    input_size2 = 16
    hidden_size = 32
    output_size = 4

    key = jax.random.PRNGKey(0)
    k1, k2, kp = jax.random.split(key, 3)
    x1 = jax.random.normal(k1, (batch, input_size1), jnp.float32)
    x2 = jax.random.normal(k2, (batch, input_size2), jnp.float32)
    params = init_params(kp, input_size1, input_size2, hidden_size, output_size)

    # Weights are static: pack/pad them exactly once, not per forward call.
    w_packed, b_packed = pack_params(params)

    out = hypernym_forward(x1, x2, w_packed, b_packed, output_size=output_size)
    out = jax.block_until_ready(out)

    ref = _reference_forward(x1, x2, params)
    assert out.shape == (batch, output_size)
    # Tolerance covers bf16 rounding of the MXU operands (weights/activations);
    # accumulation, bias, ReLU and the sigmoid are all exact f32, so the
    # sigmoid output stays well inside 5e-3 of the f32 reference.
    max_err = float(jnp.max(jnp.abs(out - ref)))
    assert max_err < 5e-3, f"mismatch vs reference: max abs err {max_err:.3e}"

    print("KERNEL_OK")
</pallas_src>

<mosaic_0001>
module attributes {stable_mosaic.version = 11 : i64} {
  func.func @_mlp_kernel(%arg0: i32, %arg1: memref<8x128xbf16, #tpu.memory_space<vmem>>, %arg2: memref<5x128x128xbf16, #tpu.memory_space<vmem>>, %arg3: memref<8x128xf32, #tpu.memory_space<vmem>>, %arg4: memref<8x128xf32, #tpu.memory_space<vmem>>) attributes {dimension_semantics = [#tpu.dimension_semantics<parallel>], iteration_bounds = array<i64: 1>, scalar_prefetch = 0 : i64, scratch_operands = 0 : i64, tpu.core_type = #tpu.core_type<tc>, window_params = [{transform_indices = @transform_0, window_bounds = array<i64: 8, 128>}, {pipeline_mode = #tpu.pipeline_mode<synchronous>, transform_indices = @transform_1, window_bounds = array<i64: 5, 128, 128>}, {pipeline_mode = #tpu.pipeline_mode<synchronous>, transform_indices = @transform_2, window_bounds = array<i64: 8, 128>}, {transform_indices = @transform_3, window_bounds = array<i64: 8, 128>}]} {
    %c0 = arith.constant 0 : index
    %c0_0 = arith.constant 0 : index
    %0 = vector.load %arg3[%c0, %c0_0] : memref<8x128xf32, #tpu.memory_space<vmem>>, vector<8x128xf32>
    %c0_1 = arith.constant 0 : index
    %c0_2 = arith.constant 0 : index
    %1 = vector.load %arg1[%c0_1, %c0_2] : memref<8x128xbf16, #tpu.memory_space<vmem>>, vector<8x128xbf16>
    %c0_3 = arith.constant 0 : index
    %c0_4 = arith.constant 0 : index
    %c0_5 = arith.constant 0 : index
    %2 = vector.load %arg2[%c0_3, %c0_4, %c0_5] : memref<5x128x128xbf16, #tpu.memory_space<vmem>>, vector<1x128x128xbf16>
    %3 = vector.shape_cast %2 : vector<1x128x128xbf16> to vector<128x128xbf16>
    %cst = arith.constant dense<0.000000e+00> : vector<8x128xf32>
    %4 = tpu.matmul %1, %3, %cst {dimension_numbers = #tpu.dot_dimension_numbers<[1], [0], [0], [1], [0, 0, 1, 1], [], []>} : vector<8x128xbf16>, vector<128x128xbf16>, vector<8x128xf32> -> vector<8x128xf32>
    %5 = vector.extract_strided_slice %0 {offsets = [0, 0], sizes = [1, 128], strides = [1, 1]} : vector<8x128xf32> to vector<1x128xf32>
    %6 = vector.broadcast %5 : vector<1x128xf32> to vector<8x128xf32>
    %7 = arith.addf %4, %6 : vector<8x128xf32>
    %cst_6 = arith.constant 0.000000e+00 : f32
    %8 = vector.broadcast %cst_6 : f32 to vector<8x128xf32>
    %9 = arith.maximumf %7, %8 : vector<8x128xf32>
    %10 = arith.truncf %9 : vector<8x128xf32> to vector<8x128xbf16>
    %c1 = arith.constant 1 : index
    %c0_7 = arith.constant 0 : index
    %c0_8 = arith.constant 0 : index
    %11 = vector.load %arg2[%c1, %c0_7, %c0_8] : memref<5x128x128xbf16, #tpu.memory_space<vmem>>, vector<1x128x128xbf16>
    %12 = vector.shape_cast %11 : vector<1x128x128xbf16> to vector<128x128xbf16>
    %cst_9 = arith.constant dense<0.000000e+00> : vector<8x128xf32>
    %13 = tpu.matmul %10, %12, %cst_9 {dimension_numbers = #tpu.dot_dimension_numbers<[1], [0], [0], [1], [0, 0, 1, 1], [], []>} : vector<8x128xbf16>, vector<128x128xbf16>, vector<8x128xf32> -> vector<8x128xf32>
    %14 = vector.extract_strided_slice %0 {offsets = [1, 0], sizes = [1, 128], strides = [1, 1]} : vector<8x128xf32> to vector<1x128xf32>
    %15 = vector.broadcast %14 : vector<1x128xf32> to vector<8x128xf32>
    %16 = arith.addf %13, %15 : vector<8x128xf32>
    %cst_10 = arith.constant 0.000000e+00 : f32
    %17 = vector.broadcast %cst_10 : f32 to vector<8x128xf32>
    %18 = arith.maximumf %16, %17 : vector<8x128xf32>
    %19 = arith.truncf %18 : vector<8x128xf32> to vector<8x128xbf16>
    %c2 = arith.constant 2 : index
    %c0_11 = arith.constant 0 : index
    %c0_12 = arith.constant 0 : index
    %20 = vector.load %arg2[%c2, %c0_11, %c0_12] : memref<5x128x128xbf16, #tpu.memory_space<vmem>>, vector<1x128x128xbf16>
    %21 = vector.shape_cast %20 : vector<1x128x128xbf16> to vector<128x128xbf16>
    %cst_13 = arith.constant dense<0.000000e+00> : vector<8x128xf32>
    %22 = tpu.matmul %19, %21, %cst_13 {dimension_numbers = #tpu.dot_dimension_numbers<[1], [0], [0], [1], [0, 0, 1, 1], [], []>} : vector<8x128xbf16>, vector<128x128xbf16>, vector<8x128xf32> -> vector<8x128xf32>
    %23 = vector.extract_strided_slice %0 {offsets = [2, 0], sizes = [1, 128], strides = [1, 1]} : vector<8x128xf32> to vector<1x128xf32>
    %24 = vector.broadcast %23 : vector<1x128xf32> to vector<8x128xf32>
    %25 = arith.addf %22, %24 : vector<8x128xf32>
    %cst_14 = arith.constant 0.000000e+00 : f32
    %26 = vector.broadcast %cst_14 : f32 to vector<8x128xf32>
    %27 = arith.maximumf %25, %26 : vector<8x128xf32>
    %28 = arith.truncf %27 : vector<8x128xf32> to vector<8x128xbf16>
    %c3 = arith.constant 3 : index
    %c0_15 = arith.constant 0 : index
    %c0_16 = arith.constant 0 : index
    %29 = vector.load %arg2[%c3, %c0_15, %c0_16] : memref<5x128x128xbf16, #tpu.memory_space<vmem>>, vector<1x128x128xbf16>
    %30 = vector.shape_cast %29 : vector<1x128x128xbf16> to vector<128x128xbf16>
    %cst_17 = arith.constant dense<0.000000e+00> : vector<8x128xf32>
    %31 = tpu.matmul %28, %30, %cst_17 {dimension_numbers = #tpu.dot_dimension_numbers<[1], [0], [0], [1], [0, 0, 1, 1], [], []>} : vector<8x128xbf16>, vector<128x128xbf16>, vector<8x128xf32> -> vector<8x128xf32>
    %32 = vector.extract_strided_slice %0 {offsets = [3, 0], sizes = [1, 128], strides = [1, 1]} : vector<8x128xf32> to vector<1x128xf32>
    %33 = vector.broadcast %32 : vector<1x128xf32> to vector<8x128xf32>
    %34 = arith.addf %31, %33 : vector<8x128xf32>
    %cst_18 = arith.constant 0.000000e+00 : f32
    %35 = vector.broadcast %cst_18 : f32 to vector<8x128xf32>
    %36 = arith.maximumf %34, %35 : vector<8x128xf32>
    %37 = arith.truncf %36 : vector<8x128xf32> to vector<8x128xbf16>
    %c4 = arith.constant 4 : index
    %c0_19 = arith.constant 0 : index
    %c0_20 = arith.constant 0 : index
    %38 = vector.load %arg2[%c4, %c0_19, %c0_20] : memref<5x128x128xbf16, #tpu.memory_space<vmem>>, vector<1x128x128xbf16>
    %39 = vector.shape_cast %38 : vector<1x128x128xbf16> to vector<128x128xbf16>
    %cst_21 = arith.constant dense<0.000000e+00> : vector<8x128xf32>
    %40 = tpu.matmul %37, %39, %cst_21 {dimension_numbers = #tpu.dot_dimension_numbers<[1], [0], [0], [1], [0, 0, 1, 1], [], []>} : vector<8x128xbf16>, vector<128x128xbf16>, vector<8x128xf32> -> vector<8x128xf32>
    %41 = vector.extract_strided_slice %0 {offsets = [4, 0], sizes = [1, 128], strides = [1, 1]} : vector<8x128xf32> to vector<1x128xf32>
    %42 = vector.broadcast %41 : vector<1x128xf32> to vector<8x128xf32>
    %43 = arith.addf %40, %42 : vector<8x128xf32>
    %cst_22 = arith.constant 0.000000e+00 : f32
    %44 = vector.broadcast %cst_22 : f32 to vector<8x128xf32>
    %45 = arith.subf %44, %43 : vector<8x128xf32>
    %46 = math.exp %45 : vector<8x128xf32>
    %cst_23 = arith.constant 1.000000e+00 : f32
    %47 = vector.broadcast %cst_23 : f32 to vector<8x128xf32>
    %48 = arith.addf %47, %46 : vector<8x128xf32>
    %cst_24 = arith.constant 1.000000e+00 : f32
    %49 = vector.broadcast %cst_24 : f32 to vector<8x128xf32>
    %50 = arith.divf %49, %48 : vector<8x128xf32>
    %c0_25 = arith.constant 0 : index
    %c0_26 = arith.constant 0 : index
    %51 = vector.load %arg4[%c0_25, %c0_26] : memref<8x128xf32, #tpu.memory_space<vmem>>, vector<8x128xf32>
    tpu.vector_store %arg4[%c0_25, %c0_26], %50 {strides = array<i32>} : memref<8x128xf32, #tpu.memory_space<vmem>>, vector<8x128xf32>,
    return
  }
  func.func @transform_0(%arg0: i32) -> (i32, i32) {
    %c0_i32 = arith.constant 0 : i32
    %c0_i32_0 = arith.constant 0 : i32
    return %arg0, %c0_i32 : i32, i32
  }
  func.func @transform_1(%arg0: i32) -> (i32, i32, i32) {
    %c0_i32 = arith.constant 0 : i32
    %c0_i32_0 = arith.constant 0 : i32
    %c0_i32_1 = arith.constant 0 : i32
    %c0_i32_2 = arith.constant 0 : i32
    return %c0_i32, %c0_i32_0, %c0_i32_1 : i32, i32, i32
  }
  func.func @transform_2(%arg0: i32) -> (i32, i32) {
    %c0_i32 = arith.constant 0 : i32
    %c0_i32_0 = arith.constant 0 : i32
    %c0_i32_1 = arith.constant 0 : i32
    return %c0_i32, %c0_i32_0 : i32, i32
  }
  func.func @transform_3(%arg0: i32) -> (i32, i32) {
    %c0_i32 = arith.constant 0 : i32
    %c0_i32_0 = arith.constant 0 : i32
    return %arg0, %c0_i32 : i32, i32
  }
}

</mosaic_0001>

<bundles_post_ra>
// kernel: hypernym_forward.1
= control target key start
LH: loop header
LB: loop body
LE: loop exit
PB: predicated region body
PF: predicated region fallthrough
CT: control target
= control target key end

     0   :  { %8 = vsyncpa [#allocation3], 0  ;;  %s853_s12 = smov [#allocation2]   ;;  %s963_s0 = inlined_call_operand.vmem [shape: bf16[8,128], index: 0, kind: input, shape index: {}]   ;;  %s964_s1 = inlined_call_operand.hbm [shape: bf16[5,128,128], index: 1, kind: input, shape index: {}]   ;;  %s965_s2 = inlined_call_operand.vmem [shape: f32[8,128], index: 2, kind: input, shape index: {}]   ;;  %s966_s3 = inlined_call_operand.vmem [shape: f32[8,128], index: 3, kind: output, shape index: {}]  }
   0x1   :  { %s16_s13 = sshll.u32 %s853_s12, 4  ;;  %s829_s16 = scalar_lea.hbm %s964_s1, 5120  ;;  %s17_s13 = int_to_ptr.vmem [resolvable:$true] %s16_s13 }
   0x2   :  { %p830_p0 = scmp.ne.s32.totalorder %s964_s1, %s829_s16  ;;  %p833_p1 = scmp.lt.u32.totalorder %s829_s16, %s964_s1 }
   0x4   :  { %p835_p2 = pnand %p833_p1, %p830_p0 }
   0x6   :  { %838 = shalt.err (!%p835_p2)
}
   0x7   :  { %s839_s21 = scalar_lea.vmem %s17_s13, 5120  ;;  %p844_p4 = scmp.lt.s32.totalorder %s17_s13, %s17_s13 }
   0x8   :  { %p840_p3 = scmp.ne.s32.totalorder %s17_s13, %s839_s21  ;;  %p845_p5 = scmp.lt.s32.totalorder %s839_s21, %s839_s21 }
   0xa   :  { %p846_p6 = por %p845_p5, %p844_p4 }
   0xc   :  { %p847_p7 = pnand %p846_p6, %p840_p3 }
   0xe   :  { %850 = shalt.err (!%p847_p7)
}
   0xf   :  { %s854_s22 = smov 64   ;;  %s855_s23 = smov 4  }
  0x10   :  { %22 = dma.hbm_to_vmem [thread:$0]  %s964_s1, 5120, %s17_s13, [#allocation3], %s854_s22, %s854_s22, %s855_s23  }
  0x11   :  { %851 = dma.done.wait [#allocation3], 5120  }
  0x12   :  { %852 = vsyncadd [#allocation3], 4294962176  ;;  %v856_v0 = vmov 0.0   ;;  %vm857_vm0 = vmmov 0   ;;  %v785_v1 = vld [vmem:[#allocation2] sm:$0xff]   ;;  %v786_v2 = vld [vmem:[#allocation2 + $0x8] sm:$0xff]   ;;  %v47_v24 = vlaneseq }
  0x13   :  { %680 = vmatprep.subr.bf16.mxu0 %v856_v0  ;;  %696 = vmatprep.mubr.msk.bf16.mxu0 %vm857_vm0, %v856_v0  ;;  %v787_v3 = vld [vmem:[#allocation2 + $0x10] sm:$0xff]   ;;  %v793_v4 = vld [vmem:[#allocation2 + $0x40] sm:$0xff]   ;;  %v788_v5 = vld [vmem:[#allocation2 + $0x18] sm:$0xff]  }
  0x14   :  { %700 = vmatprep.subr.bf16.mxu1 %v856_v0  ;;  %716 = vmatprep.mubr.msk.bf16.mxu1 %vm857_vm0, %v856_v0  ;;  %v794_v6 = vld [vmem:[#allocation2 + $0x48] sm:$0xff]   ;;  %v789_v7 = vld [vmem:[#allocation2 + $0x20] sm:$0xff]   ;;  %v795_v8 = vld [vmem:[#allocation2 + $0x50] sm:$0xff]   ;;  %v923_v25 = vshrl.u32 %v47_v24, 7 }
  0x15   :  { %681 = vmatpush3.bf16.msra.mxu0 %v785_v1  ;;  %701 = vmatpush3.bf16.msra.mxu1 %v793_v4  ;;  %v790_v9 = vld [vmem:[#allocation2 + $0x28] sm:$0xff]   ;;  %v796_v10 = vld [vmem:[#allocation2 + $0x58] sm:$0xff]   ;;  %v791_v11 = vld [vmem:[#allocation2 + $0x30] sm:$0xff]  }
  0x16   :  { %682 = vmatprep.subr.bf16.mxu0 %v856_v0  ;;  %702 = vmatprep.subr.bf16.mxu1 %v856_v0  ;;  %v797_v12 = vld [vmem:[#allocation2 + $0x60] sm:$0xff]   ;;  %v792_v13 = vld [vmem:[#allocation2 + $0x38] sm:$0xff]   ;;  %v798_v14 = vld [vmem:[#allocation2 + $0x68] sm:$0xff]   ;;  %v49_v26 = vsub.s32 0, %v923_v25  ;;  %v160_v44 = vsub.s32 1, %v923_v25  ;;  %v271_v61 = vsub.s32 2, %v923_v25 }
  0x17   :  { %v30_v15 = vld [vmem:[%s963_s0] sm:$0xf]  ;;  %v799_v16 = vld [vmem:[#allocation2 + $0x70] sm:$0xff]   ;;  %v800_v17 = vld [vmem:[#allocation2 + $0x78] sm:$0xff]  }
  0x18   :  { %v801_v18 = vld [vmem:[#allocation2 + $0x80] sm:$0xff]   ;;  %v802_v19 = vld [vmem:[#allocation2 + $0x88] sm:$0xff]   ;;  %v803_v20 = vld [vmem:[#allocation2 + $0x90] sm:$0xff]  }
  0x19   :  { %683 = vmatpush3.bf16.msra.mxu0 %v786_v2  ;;  %703 = vmatpush3.bf16.msra.mxu1 %v794_v6  ;;  %v804_v21 = vld [vmem:[#allocation2 + $0x98] sm:$0xff]   ;;  %v805_v22 = vld [vmem:[#allocation2 + $0xa0] sm:$0xff]   ;;  %v806_v23 = vld [vmem:[#allocation2 + $0xa8] sm:$0xff]  }
  0x1a   :  { %684 = vmatprep.subr.bf16.mxu0 %v856_v0  ;;  %704 = vmatprep.subr.bf16.mxu1 %v856_v0  ;;  %v929_v27 = vld [vmem:[%s965_s2] sm:$0xff]  ;;  %v807_v36 = vld [vmem:[#allocation2 + $0xb0] sm:$0xff]   ;;  %v808_v37 = vld [vmem:[#allocation2 + $0xb8] sm:$0xff]  }
  0x1b   :  { %v50_v28 = vrot.slane %v929_v27, %v49_v26  ;;  %v809_v38 = vld [vmem:[#allocation2 + $0xc0] sm:$0xff]   ;;  %v810_v39 = vld [vmem:[#allocation2 + $0xc8] sm:$0xff]   ;;  %v811_v40 = vld [vmem:[#allocation2 + $0xd0] sm:$0xff]   ;;  %v161_v45 = vrot.slane %v929_v27, %v160_v44  ;;  %v272_v62 = vrot.slane %v929_v27, %v271_v61 }
  0x1c   :  { %v812_v41 = vld [vmem:[#allocation2 + $0xd8] sm:$0xff]   ;;  %v813_v42 = vld [vmem:[#allocation2 + $0xe0] sm:$0xff]   ;;  %v814_v43 = vld [vmem:[#allocation2 + $0xe8] sm:$0xff]  }
  0x1d   :  { %685 = vmatpush3.bf16.msra.mxu0 %v787_v3  ;;  %705 = vmatpush3.bf16.msra.mxu1 %v795_v8  ;;  %v815_v53 = vld [vmem:[#allocation2 + $0xf0] sm:$0xff]   ;;  %v816_v54 = vld [vmem:[#allocation2 + $0xf8] sm:$0xff]   ;;  %v817_v55 = vld [vmem:[#allocation2 + $0x100] sm:$0xff]  }
  0x1e   :  { %686 = vmatprep.subr.bf16.mxu0 %v856_v0  ;;  %706 = vmatprep.subr.bf16.mxu1 %v856_v0  ;;  %v818_v56 = vld [vmem:[#allocation2 + $0x108] sm:$0xff]   ;;  %v819_v57 = vld [vmem:[#allocation2 + $0x110] sm:$0xff]   ;;  %v820_v58 = vld [vmem:[#allocation2 + $0x118] sm:$0xff]  }
  0x1f   :  { %v821_v59 = vld [vmem:[#allocation2 + $0x120] sm:$0xff]   ;;  %v822_v60 = vld [vmem:[#allocation2 + $0x128] sm:$0xff]   ;;  %v824_v8 = vld [vmem:[#allocation2 + $0x138] sm:$0xff]  }
  0x21   :  { %687 = vmatpush3.bf16.msra.mxu0 %v788_v5  ;;  %707 = vmatpush3.bf16.msra.mxu1 %v796_v10 }
  0x22   :  { %688 = vmatprep.subr.bf16.mxu0 %v856_v0  ;;  %708 = vmatprep.subr.bf16.mxu1 %v856_v0 }
  0x25   :  { %689 = vmatpush3.bf16.msra.mxu0 %v789_v7  ;;  %709 = vmatpush3.bf16.msra.mxu1 %v797_v12  ;;  %v823_v7 = vld [vmem:[#allocation2 + $0x130] sm:$0xff]  }
  0x26   :  { %690 = vmatprep.subr.bf16.mxu0 %v856_v0  ;;  %710 = vmatprep.subr.bf16.mxu1 %v856_v0 }
  0x29   :  { %691 = vmatpush3.bf16.msra.mxu0 %v790_v9  ;;  %711 = vmatpush3.bf16.msra.mxu1 %v798_v14  ;;  %v382_v9 = vsub.s32 3, %v923_v25 }
  0x2a   :  { %692 = vmatprep.subr.bf16.mxu0 %v856_v0  ;;  %712 = vmatprep.subr.bf16.mxu1 %v856_v0 }
  0x2b   :  { %v383_v10 = vrot.slane %v929_v27, %v382_v9 }
  0x2d   :  { %693 = vmatpush3.bf16.msra.mxu0 %v791_v11  ;;  %713 = vmatpush3.bf16.msra.mxu1 %v799_v16 }
  0x2e   :  { %694 = vmatprep.subr.bf16.mxu0 %v856_v0  ;;  %714 = vmatprep.subr.bf16.mxu1 %v856_v0 }
  0x31   :  { %695 = vmatpush3.bf16.msra.mxu0 %v792_v13  ;;  %715 = vmatpush3.bf16.msra.mxu1 %v800_v17 }
  0x32   :  { %720 = vmatprep.subr.bf16.mxu0 %v856_v0  ;;  %740 = vmatprep.subr.bf16.mxu1 %v856_v0 }
  0x34   :  { %697 = vmatmul.mubr.bf16.vlgmr.msra.gmra.mrb[0].mxu0 %v30_v15 }
  0x35   :  { %736 = vmatprep.mubr.msk.bf16.mxu0 %vm857_vm0, %v856_v0  ;;  %721 = vmatpush3.bf16.msra.mxu0 %v801_v18  ;;  %v493_v18 = vsub.s32 4, %v923_v25 }
  0x36   :  { %722 = vmatprep.subr.bf16.mxu0 %v856_v0 }
  0x39   :  { %723 = vmatpush3.bf16.msra.mxu0 %v802_v19  ;;  %v494_v19 = vrot.slane %v929_v27, %v493_v18 }
  0x3a   :  { %724 = vmatprep.subr.bf16.mxu0 %v856_v0 }
  0x3d   :  { %725 = vmatpush3.bf16.msra.mxu0 %v803_v20 }
  0x3e   :  { %726 = vmatprep.subr.bf16.mxu0 %v856_v0 }
  0x41   :  { %727 = vmatpush3.bf16.msra.mxu0 %v804_v21 }
  0x42   :  { %728 = vmatprep.subr.bf16.mxu0 %v856_v0 }
  0x45   :  { %729 = vmatpush3.bf16.msra.mxu0 %v805_v22 }
  0x46   :  { %730 = vmatprep.subr.bf16.mxu0 %v856_v0 }
  0x49   :  { %731 = vmatpush3.bf16.msra.mxu0 %v806_v23 }
  0x4a   :  { %732 = vmatprep.subr.bf16.mxu0 %v856_v0 }
  0x4d   :  { %733 = vmatpush3.bf16.msra.mxu0 %v807_v36 }
  0x4e   :  { %734 = vmatprep.subr.bf16.mxu0 %v856_v0 }
  0x51   :  { %735 = vmatpush3.bf16.msra.mxu0 %v808_v37 }
  0x52   :  { %760 = vmatprep.subr.bf16.mxu0 %v856_v0 }
 0x107   :  { %v133_v29 = vpop.f32.mrb[0].mxu0 }
 0x108   :  { %v134_v30 = vadd.f32 %v133_v29, %v50_v28  ;;  %v698_v31 = vpop.f32.mrb[1].mxu0 }
 0x109   :  { %v136_v32 = vpop.f32.mrb[2].mxu0 }
 0x10a   :  { %v139_v33 = vmax.f32 %v134_v30, 0.0  ;;  %v699_v34 = vpop.f32.mrb[3].mxu0 }
 0x10c   :  { %v140_v35 = vpack.c.bf16 %v139_v33, %v139_v33 }
 0x10e   :  { %717 = vmatmul.mubr.bf16.vlgmr.msra.gmra.mrb[0].mxu1 %v140_v35 }
 0x10f   :  { %756 = vmatprep.mubr.msk.bf16.mxu1 %vm857_vm0, %v856_v0  ;;  %741 = vmatpush3.bf16.msra.mxu1 %v809_v38 }
 0x110   :  { %742 = vmatprep.subr.bf16.mxu1 %v856_v0 }
 0x113   :  { %743 = vmatpush3.bf16.msra.mxu1 %v810_v39 }
 0x114   :  { %744 = vmatprep.subr.bf16.mxu1 %v856_v0 }
 0x117   :  { %745 = vmatpush3.bf16.msra.mxu1 %v811_v40 }
 0x118   :  { %746 = vmatprep.subr.bf16.mxu1 %v856_v0 }
 0x11b   :  { %747 = vmatpush3.bf16.msra.mxu1 %v812_v41 }
 0x11c   :  { %748 = vmatprep.subr.bf16.mxu1 %v856_v0 }
 0x11f   :  { %749 = vmatpush3.bf16.msra.mxu1 %v813_v42 }
 0x120   :  { %750 = vmatprep.subr.bf16.mxu1 %v856_v0 }
 0x123   :  { %751 = vmatpush3.bf16.msra.mxu1 %v814_v43 }
 0x124   :  { %752 = vmatprep.subr.bf16.mxu1 %v856_v0 }
 0x127   :  { %753 = vmatpush3.bf16.msra.mxu1 %v815_v53 }
 0x128   :  { %754 = vmatprep.subr.bf16.mxu1 %v856_v0 }
 0x12b   :  { %755 = vmatpush3.bf16.msra.mxu1 %v816_v54 }
 0x1e1   :  { %v244_v46 = vpop.f32.mrb[0].mxu1 }
 0x1e2   :  { %v245_v47 = vadd.f32 %v244_v46, %v161_v45  ;;  %v718_v48 = vpop.f32.mrb[1].mxu1 }
 0x1e3   :  { %v247_v49 = vpop.f32.mrb[2].mxu1 }
 0x1e4   :  { %v250_v50 = vmax.f32 %v245_v47, 0.0  ;;  %v719_v51 = vpop.f32.mrb[3].mxu1 }
 0x1e6   :  { %v251_v52 = vpack.c.bf16 %v250_v50, %v250_v50 }
 0x1e8   :  { %737 = vmatmul.mubr.bf16.vlgmr.msra.gmra.mrb[4].mxu0 %v251_v52 }
 0x1e9   :  { %776 = vmatprep.mubr.msk.bf16.mxu0 %vm857_vm0, %v856_v0  ;;  %761 = vmatpush3.bf16.msra.mxu0 %v817_v55 }
 0x1ea   :  { %762 = vmatprep.subr.bf16.mxu0 %v856_v0 }
 0x1ed   :  { %763 = vmatpush3.bf16.msra.mxu0 %v818_v56 }
 0x1ee   :  { %764 = vmatprep.subr.bf16.mxu0 %v856_v0 }
 0x1f1   :  { %765 = vmatpush3.bf16.msra.mxu0 %v819_v57 }
 0x1f2   :  { %766 = vmatprep.subr.bf16.mxu0 %v856_v0 }
 0x1f5   :  { %767 = vmatpush3.bf16.msra.mxu0 %v820_v58 }
 0x1f6   :  { %768 = vmatprep.subr.bf16.mxu0 %v856_v0 }
 0x1f9   :  { %769 = vmatpush3.bf16.msra.mxu0 %v821_v59 }
 0x1fa   :  { %770 = vmatprep.subr.bf16.mxu0 %v856_v0 }
 0x1fd   :  { %771 = vmatpush3.bf16.msra.mxu0 %v822_v60 }
 0x1fe   :  { %772 = vmatprep.subr.bf16.mxu0 %v856_v0 }
 0x201   :  { %773 = vmatpush3.bf16.msra.mxu0 %v823_v7 }
 0x202   :  { %774 = vmatprep.subr.bf16.mxu0 %v856_v0 }
 0x205   :  { %775 = vmatpush3.bf16.msra.mxu0 %v824_v8 }
 0x2bb   :  { %v355_v63 = vpop.f32.mrb[4].mxu0 }
 0x2bc   :  { %v356_v1 = vadd.f32 %v355_v63, %v272_v62  ;;  %v738_v2 = vpop.f32.mrb[5].mxu0 }
 0x2bd   :  { %v358_v3 = vpop.f32.mrb[6].mxu0 }
 0x2be   :  { %v361_v4 = vmax.f32 %v356_v1, 0.0  ;;  %v739_v5 = vpop.f32.mrb[7].mxu0 }
 0x2c0   :  { %v362_v6 = vpack.c.bf16 %v361_v4, %v361_v4 }
 0x2c2   :  { %757 = vmatmul.mubr.bf16.vlgmr.msra.gmra.mrb[4].mxu1 %v362_v6 }
 0x395   :  { %v466_v11 = vpop.f32.mrb[4].mxu1 }
 0x396   :  { %v467_v12 = vadd.f32 %v466_v11, %v383_v10  ;;  %v758_v13 = vpop.f32.mrb[5].mxu1 }
 0x397   :  { %v469_v14 = vpop.f32.mrb[6].mxu1 }
 0x398   :  { %v472_v15 = vmax.f32 %v467_v12, 0.0  ;;  %v759_v16 = vpop.f32.mrb[7].mxu1 }
 0x39a   :  { %v473_v17 = vpack.c.bf16 %v472_v15, %v472_v15 }
 0x39c   :  { %777 = vmatmul.mubr.bf16.vlgmr.msra.gmra.mrb[8].mxu0 %v473_v17 }
 0x46f   :  { %v577_v20 = vpop.f32.mrb[8].mxu0 }
 0x470   :  { %v578_v0 = vadd.f32 %v577_v20, %v494_v19  ;;  %v778_v21 = vpop.f32.mrb[9].mxu0 }
 0x471   :  { %v580_v22 = vpop.f32.mrb[10].mxu0 }
 0x472   :  { %v583_v23 = vsub.f32 0.0, %v578_v0  ;;  %v779_v24 = vpop.f32.mrb[11].mxu0 }
 0x474   :  { %v584_v26 = vmul.f32 1.442695, %v583_v23 }
 0x476   :  { %825 = vpow2.f32 %v584_v26 }
 0x480   :  { %v826_v28 = vpop.eup %825 }
 0x481   :  { %v586_v29 = vadd.f32 1.0, %v826_v28 }
 0x483   :  { %827 = vrcp.f32 %v586_v29 }
 0x48d   :  { %v828_v30 = vpop.eup %827 }
 0x48e   :  { %589 = vst [vmem:[%s966_s3] sm:$0xff] %v828_v30 }
 0x48f   :  { %594 = vsyncpa [#allocation3], 1 }

</bundles_post_ra>
